<compile_context>
chip_gen: v5e
topology: v5e:2x2
jax: 0.10.0
libtpu: 0.0.40
codegen_flags: <defaults>
</compile_context>

<pallas_src>
import functools

import jax
import jax.numpy as jnp
import numpy as np
from jax.experimental import pallas as pl
from jax.experimental.pallas import tpu as pltpu

_LANE = 128
_SUBLANE = 8


def _round_up(x, m):
    return ((x + m - 1) // m) * m


def _round_down(x, m):
    return (x // m) * m


def _vmem_capacity_bytes():
    try:
        return int(pltpu.get_tpu_info().vmem_capacity_bytes)
    except Exception:
        return 64 * 1024 * 1024  # conservative (v7x per-TC)


def _ls_ce_kernel(pred_ref, tgt_ref, out_ref, *, smoothing, n_rows, block_n):
    """One row tile: fused label-smoothing CE partial sum.

    per-row loss = (m + lse) - sum_c(w * x)
      with w = (1-s)+s/C at the target class and s/C elsewhere,
    which is algebraically identical to sum_c(-smoothed_onehot * log_softmax(x)).
    """
    i = pl.program_id(0)

    x = pred_ref[...].astype(jnp.float32)    # (block_n, C), f32 accumulation
    t = tgt_ref[...]                         # (block_n, 1) int32
    bn, c = x.shape

    # Class-index row (1, C); broadcasts against the (bn, 1) target in the compare.
    col_ids = jax.lax.broadcasted_iota(jnp.int32, (1, c), 1)

    # Numerically stable log-sum-exp over the class (lane) dim.
    m = jnp.max(x, axis=-1, keepdims=True)                              # (bn, 1)
    lse = jnp.log(jnp.sum(jnp.exp(x - m), axis=-1, keepdims=True))      # (bn, 1)

    # Single fused weighted reduction replacing the separate x[target] and sum_c x.
    base = jnp.float32(smoothing / c)
    w = jnp.where(col_ids == t, jnp.float32(1.0 - smoothing) + base, base)
    corr = jnp.sum(w * x, axis=-1, keepdims=True)                       # (bn, 1)

    per_row = (m + lse) - corr

    # Mask rows of the final partial tile (only compiled when needed).
    # NOTE: tail rows come from past-the-end / uninitialized VMEM; this is safe only
    # because jnp.where SELECTS them away. Do NOT replace with an arithmetic
    # multiply mask (NaN * 0 == NaN).
    if n_rows % block_n != 0:
        row_ids = i * block_n + jax.lax.broadcasted_iota(jnp.int32, (bn, 1), 0)
        per_row = jnp.where(row_ids < n_rows, per_row, 0.0)

    # Lane/sublane-dense per-tile partial sum; wrapper reads element [0, 0].
    block_sum = jnp.sum(per_row).reshape(1, 1, 1)
    out_ref[...] = jnp.broadcast_to(block_sum, out_ref.shape)


def _auto_block_n(n, c, itemsize):
    """Largest row tile keeping (pred double-buffer + ~6 f32 temps) in VMEM budget."""
    vmem_cap = _vmem_capacity_bytes()
    budget = vmem_cap // 2  # leave headroom for output/target buffers & compiler scratch

    # Per-row VMEM footprint: 2x pred tile (double buffer, input dtype) +
    # ~6 full-width f32 temporaries (upcast copy, exp, weights, products, ...).
    per_row_bytes = c * (2 * itemsize + 6 * 4) + 16
    bn = _round_down(budget // per_row_bytes, _SUBLANE)
    bn = max(_SUBLANE, min(bn, 16384))

    # Ensure at least 2 grid tiles so the "parallel" axis can shard across the two
    # TensorCores on v7x (and never make the block bigger than needed).
    half = _round_up(max(1, pl.cdiv(n, 2)), _SUBLANE)
    bn = min(bn, max(_SUBLANE, half))
    return bn


def label_smoothing_cross_entropy(pred, target, smoothing=0.1, block_n=None):
    """pred: (N, C) float logits (f32 or bf16 — bf16 preferred on v5e/v6e, kernel
    accumulates in f32); target: (N,) int labels. Returns a scalar f32 loss."""
    n, c = pred.shape
    itemsize = jnp.dtype(pred.dtype).itemsize

    tgt = target.reshape(n, 1).astype(jnp.int32)

    if block_n is None:
        block_n = _auto_block_n(n, c, itemsize)
    assert block_n % _SUBLANE == 0

    num_tiles = pl.cdiv(n, block_n)

    # Need-based VMEM limit (no inflated floor), clamped under the physical capacity.
    vmem_cap = _vmem_capacity_bytes()
    pred_tile_bytes = block_n * c * itemsize
    tmp_bytes = block_n * c * 4 * 6
    vmem_need = 2 * pred_tile_bytes + tmp_bytes + 4 * block_n * 4 + (2 << 20)
    vmem_limit = int(min(max(vmem_need, 8 * 1024 * 1024), int(0.85 * vmem_cap)))

    partial = pl.pallas_call(
        functools.partial(
            _ls_ce_kernel,
            smoothing=float(smoothing),
            n_rows=n,
            block_n=block_n,
        ),
        out_shape=jax.ShapeDtypeStruct((num_tiles, _SUBLANE, _LANE), jnp.float32),
        grid_spec=pltpu.PrefetchScalarGridSpec(
            num_scalar_prefetch=0,
            grid=(num_tiles,),
            in_specs=[
                # Unpadded logits: last block dim == full C (legal for any C).
                pl.BlockSpec((block_n, c), lambda i: (i, 0)),
                pl.BlockSpec((block_n, 1), lambda i: (i, 0)),
            ],
            # Each tile writes its own dense (8,128) partial-sum block -> axis can be
            # "parallel" (megacore sharding on v7x; harmless on v5e/v6e).
            out_specs=pl.BlockSpec((1, _SUBLANE, _LANE), lambda i: (i, 0, 0)),
        ),
        compiler_params=pltpu.CompilerParams(
            dimension_semantics=("parallel",),
            vmem_limit_bytes=vmem_limit,
        ),
    )(pred, tgt)

    total = jnp.sum(partial[:, 0, 0])
    return total / jnp.float32(n)


def _reference(pred, target, smoothing=0.1):
    """Pure-JAX reference mirroring the PyTorch forward exactly."""
    log_probs = jax.nn.log_softmax(pred.astype(jnp.float32), axis=-1)
    c = pred.shape[-1]
    t = jax.nn.one_hot(target, c, dtype=jnp.float32)
    t = t * (1.0 - smoothing) + smoothing / c
    loss = -t * log_probs
    return loss.sum(axis=-1).mean()


if __name__ == "__main__":
    key = jax.random.PRNGKey(0)
    k1, k2, k3, k4 = jax.random.split(key, 4)

    # Primary check: batch=16, classes=32 (C is NOT a multiple of 128 -> exercises the
    # unpadded full-C BlockSpec path).
    N, C = 16, 32
    pred = jax.random.normal(k1, (N, C), dtype=jnp.float32)
    target = jax.random.randint(k2, (N,), 0, C, dtype=jnp.int32)

    loss = jax.block_until_ready(label_smoothing_cross_entropy(pred, target, smoothing=0.1))
    ref = _reference(pred, target, smoothing=0.1)
    np.testing.assert_allclose(np.asarray(loss), np.asarray(ref), rtol=1e-5, atol=1e-5)

    # Ragged batch: exercises the cdiv grid + tail-row masking path.
    N2 = 12
    pred2 = jax.random.normal(k3, (N2, C), dtype=jnp.float32)
    target2 = jax.random.randint(k4, (N2,), 0, C, dtype=jnp.int32)

    loss2 = jax.block_until_ready(label_smoothing_cross_entropy(pred2, target2, smoothing=0.1))
    ref2 = _reference(pred2, target2, smoothing=0.1)
    np.testing.assert_allclose(np.asarray(loss2), np.asarray(ref2), rtol=1e-5, atol=1e-5)

    # bf16 input contract (halves HBM traffic on v5e/v6e; f32 math inside the kernel).
    pred_bf16 = pred.astype(jnp.bfloat16)
    loss3 = jax.block_until_ready(label_smoothing_cross_entropy(pred_bf16, target, smoothing=0.1))
    ref3 = _reference(pred_bf16, target, smoothing=0.1)
    np.testing.assert_allclose(np.asarray(loss3), np.asarray(ref3), rtol=1e-4, atol=1e-5)

    print("KERNEL_OK")
</pallas_src>

<mosaic_0001>
module attributes {stable_mosaic.version = 11 : i64} {
  func.func @_ls_ce_kernel(%arg0: i32, %arg1: memref<8x32xf32, #tpu.memory_space<vmem>>, %arg2: memref<8x1xi32, #tpu.memory_space<vmem>>, %arg3: memref<1x8x128xf32, #tpu.memory_space<vmem>>) attributes {dimension_semantics = [#tpu.dimension_semantics<parallel>], iteration_bounds = array<i64: 2>, scalar_prefetch = 0 : i64, scratch_operands = 0 : i64, tpu.core_type = #tpu.core_type<tc>, window_params = [{transform_indices = @transform_0, window_bounds = array<i64: 8, 32>}, {transform_indices = @transform_1, window_bounds = array<i64: 8, 1>}, {transform_indices = @transform_2, window_bounds = array<i64: 1, 8, 128>}]} {
    %c0 = arith.constant 0 : index
    %c0_0 = arith.constant 0 : index
    %0 = vector.load %arg1[%c0, %c0_0] : memref<8x32xf32, #tpu.memory_space<vmem>>, vector<8x32xf32>
    %c0_1 = arith.constant 0 : index
    %c0_2 = arith.constant 0 : index
    %1 = vector.load %arg2[%c0_1, %c0_2] : memref<8x1xi32, #tpu.memory_space<vmem>>, vector<8x1xi32>
    %2 = tpu.iota {dimensions = array<i32: 1>} : vector<1x32xi32>
    %cst = arith.constant dense<0xFF800000> : vector<8xf32>
    %3 = vector.multi_reduction <maximumf>, %0, %cst [1] : vector<8x32xf32> to vector<8xf32>
    %4 = vector.shape_cast %3 : vector<8xf32> to vector<8x1xf32>
    %5 = vector.broadcast %4 : vector<8x1xf32> to vector<8x32xf32>
    %6 = arith.subf %0, %5 : vector<8x32xf32>
    %7 = math.exp %6 : vector<8x32xf32>
    %cst_3 = arith.constant dense<0.000000e+00> : vector<8xf32>
    %8 = vector.multi_reduction <add>, %7, %cst_3 [1] : vector<8x32xf32> to vector<8xf32>
    %9 = vector.shape_cast %8 : vector<8xf32> to vector<8x1xf32>
    %10 = math.log %9 : vector<8x1xf32>
    %11 = vector.broadcast %2 : vector<1x32xi32> to vector<8x32xi32>
    %12 = vector.broadcast %1 : vector<8x1xi32> to vector<8x32xi32>
    %13 = arith.cmpi eq, %11, %12 : vector<8x32xi32>
    %cst_4 = arith.constant 0.899999976 : f32
    %cst_5 = arith.constant 3.125000e-03 : f32
    %14 = arith.addf %cst_4, %cst_5 : f32
    %cst_6 = arith.constant 3.125000e-03 : f32
    %15 = vector.broadcast %14 : f32 to vector<8x32xf32>
    %16 = vector.broadcast %cst_6 : f32 to vector<8x32xf32>
    %17 = arith.select %13, %15, %16 : vector<8x32xi1>, vector<8x32xf32>
    %18 = arith.mulf %17, %0 : vector<8x32xf32>
    %cst_7 = arith.constant dense<0.000000e+00> : vector<8xf32>
    %19 = vector.multi_reduction <add>, %18, %cst_7 [1] : vector<8x32xf32> to vector<8xf32>
    %20 = vector.shape_cast %19 : vector<8xf32> to vector<8x1xf32>
    %21 = arith.addf %4, %10 : vector<8x1xf32>
    %22 = arith.subf %21, %20 : vector<8x1xf32>
    %23 = vector.shape_cast %22 : vector<8x1xf32> to vector<1x8x1xf32>
    %cst_8 = arith.constant dense<0.000000e+00> : vector<1xf32>
    %24 = vector.multi_reduction <add>, %23, %cst_8 [1, 2] : vector<1x8x1xf32> to vector<1xf32>
    %25 = vector.shape_cast %24 : vector<1xf32> to vector<1x1x1xf32>
    %26 = vector.extract %25[0, 0, 0] : f32 from vector<1x1x1xf32>
    %27 = vector.broadcast %26 : f32 to vector<1x1x1xf32>
    %28 = vector.shape_cast %27 : vector<1x1x1xf32> to vector<1x1x1xf32>
    %29 = vector.broadcast %28 : vector<1x1x1xf32> to vector<1x8x128xf32>
    %c0_9 = arith.constant 0 : index
    %c0_10 = arith.constant 0 : index
    %c0_11 = arith.constant 0 : index
    %30 = vector.load %arg3[%c0_9, %c0_10, %c0_11] : memref<1x8x128xf32, #tpu.memory_space<vmem>>, vector<1x8x128xf32>
    tpu.vector_store %arg3[%c0_9, %c0_10, %c0_11], %29 {strides = array<i32>} : memref<1x8x128xf32, #tpu.memory_space<vmem>>, vector<1x8x128xf32>,
    return
  }
  func.func @transform_0(%arg0: i32) -> (i32, i32) {
    %c0_i32 = arith.constant 0 : i32
    %c0_i32_0 = arith.constant 0 : i32
    return %arg0, %c0_i32 : i32, i32
  }
  func.func @transform_1(%arg0: i32) -> (i32, i32) {
    %c0_i32 = arith.constant 0 : i32
    %c0_i32_0 = arith.constant 0 : i32
    return %arg0, %c0_i32 : i32, i32
  }
  func.func @transform_2(%arg0: i32) -> (i32, i32, i32) {
    %c0_i32 = arith.constant 0 : i32
    %c0_i32_0 = arith.constant 0 : i32
    %c0_i32_1 = arith.constant 0 : i32
    return %arg0, %c0_i32, %c0_i32_0 : i32, i32, i32
  }
}

</mosaic_0001>

<bundles_post_ra>
// kernel: tpu_custom_call.1
= control target key start
LH: loop header
LB: loop body
LE: loop exit
PB: predicated region body
PF: predicated region fallthrough
CT: control target
= control target key end

     0   :  { %7 = vsyncpa [#allocation3], 0  ;;  %s514_s0 = inlined_call_operand.vmem [shape: f32[16,32], index: 0, kind: input, shape index: {}]   ;;  %s515_s1 = inlined_call_operand.vmem [shape: s32[16,1], index: 1, kind: input, shape index: {}]   ;;  %s516_s2 = inlined_call_operand.hbm [shape: f32[2,8,128], index: 2, kind: output, shape index: {}]  }
   0x1   :  { %9 = vsyncpa [#allocation3 + $0x1], 0  ;;  %s423_s9 = smov 0   ;;  %s425_s10 = smov 0  }
   0x2   :  { %s427_s11 = smov 0   ;;  %s429_s12 = smov 0  }
   0x3 LB: > { %s444_s13 = sadd.s32 4294967295, %s404_s12   ;;  %s283_s14 = sadd.s32 4294967294, %s404_s12   ;;  %s404_s12 = sphi %s429_s12, %s522_s12   ;;  %s400_s11 = sphi %s427_s11, %s521_s11   ;;  %s396_s10 = sphi %s425_s10, %s520_s10   ;;  %s392_s9 = sphi %s423_s9, %s519_s9  }
   0x4   : > { %s448_s15 = sadd.s32 1, %s404_s12   ;;  %s74_s16 = sadd.s32 1, %s400_s11 }
   0x5   : > { %s71_s17 = ssub.s32 %s404_s12, %s448_s15  ;;  %p84_p0 = scmp.ne.s32.totalorder %s400_s11, %s396_s10 }
   0x6   : > { %p72_p1 = scmp.eq.s32.totalorder %s71_s17, 0  ;;  %p85_p2 = scmp.eq.s32.totalorder %s444_s13, 1 }
   0x7   : > { %p90_p3 = scmp.ne.s32.totalorder %s396_s10, %s392_s9  ;;  %p91_p4 = scmp.eq.s32.totalorder %s283_s14, 1 }
   0x8   : > { %s459_s18 = scalar_select %p72_p1, %s400_s11, %s74_s16  }
   0x9   : > { %p461_p5 = por %p85_p2, %p84_p0  ;;  %p465_p6 = por %p91_p4, %p90_p3 }
   0xa   : > { %p286_p7 = scmp.ge.s32.totalorder %s404_s12, 1  ;;  %p123_p8 = scmp.lt.s32.totalorder %s404_s12, 3 }
   0xc   : > { %p124_p9 = pnand %p286_p7, %p123_p8 }
   0xd   : > { %p148_p10 = scmp.lt.s32.totalorder (!%p124_p9), %s444_s13, 1  ;;  %s145_s29 = sand.u32 (!%p124_p9), 1, %s396_s10  }
   0xe   : > { %127 = sbr.rel (%p124_p9) target bundleno = 466 (0x1d2), region = 28  ;;  %s287_s30 = sshll.u32 (!%p124_p9), %s145_s29, 3 }
   0xf   : > { %s291_s3 = sshll.u32 (!%p124_p9), %s444_s13, 3  ;;  %s147_s7 = scalar_lea.vmem (!%p124_p9), [#allocation2], %s287_s30 }
  0x10   : > { %s207_s6 = scalar_lea.hbm (!%p124_p9), %s516_s2, %s291_s3  ;;  %s209_s8 = sshll.u32 (!%p124_p9), %s147_s7, 4  ;;  %s210_s8 = int_to_ptr.vmem [resolvable:$true] %s209_s8 }
  0x11   : > { %s211_s14 = sshll.u32 (!%p124_p9), %s207_s6, 4  ;;  %s197_s17 = scalar_lea.sflag (!%p124_p9), [#allocation3], %s145_s29  ;;  %s212_s14 = int_to_ptr.hbm [resolvable:$true] %s211_s14 }
  0x12   : > { %s362_s24 = scalar_lea.hbm (!%p124_p9), %s516_s2, 16 }
  0x13   : > { %v406_v0 = vmov 0   ;;  %s149_s21 = scalar_select %p148_p10, %s444_s13, 1  ;;  %vm160_vm0 = vcmask 261120   ;;  %v158_v9 = vlaneseq  ;;  %v407_v12 = vmov 0.003125  }
  0x14   : > { %337 = vset.pattern.permute.xlu0 %v406_v0  ;;  %vm183_vm2 = vcmask 7168  }
  0x15   : > { %s288_s22 = sshll.u32 %s149_s21, 3  ;;  %v159_v10 = vand.u32 127, %v158_v9  ;;  %s356_s21 = sshra.s32 %s212_s14, 4  ;;  %s357_s21 = int_to_ptr.hbm [resolvable:$true] %s356_s21 }
  0x16   : > { %s151_s25 = scalar_lea.vmem %s514_s0, %s288_s22  ;;  %s155_s28 = scalar_lea.vmem %s515_s1, %s288_s22 }
  0x17   : > { %v156_v1 = vld [vmem:[%s151_s25] sm:$0xff]  ;;  %s358_s22 = scalar_lea.hbm %s357_s21, 8  ;;  %p363_p0 = scmp.lt.s32.totalorder %s357_s21, %s516_s2 }
  0x18   : > { %v161_v2 = vsel %vm160_vm0, %v156_v1, -inf  ;;  %v157_v3 = vld [vmem:[%s155_s28] sm:$0xff]  ;;  %p359_p11 = scmp.ne.s32.totalorder %s357_s21, %s358_s22  ;;  %p364_p1 = scmp.lt.s32.totalorder %s362_s24, %s358_s22 }
  0x19   : > { %162 = vmax.xlane.f32.xlu0 %v161_v2 }
  0x1a   : > { %p360_p12 = pnand %p359_p11, %p461_p5  ;;  %p365_p2 = por %p364_p1, %p363_p0 }
  0x1c   : > { %p361_p13 = pneg %p360_p12 }
  0x1e   : > { %p366_p3 = pnand %p365_p2, %p361_p13 }
  0x2d   : > { %173 = vperm.xlu0 %337, %v157_v3  }
  0x8c   : > { %v163_v4 = vpop.xlane.xlu0 %162 }
  0x8d   : > { %v164_v5 = vsub.f32 %v156_v1, %v163_v4 }
  0x8f   : > { %v165_v6 = vmul.f32 1.442695, %v164_v5 }
  0x91   : > { %338 = vpow2.f32 %v165_v6 }
  0x97   : > { %v339_v7 = vpop.eup %338 }
  0x98   : > { %v167_v8 = vsel %vm160_vm0, %v339_v7, 0.0 }
  0x99   : > { %168 = vadd.xlane.f32.xlu1 %v167_v8 }
  0x9f   : > { %v174_v11 = vpop.permute.xlu0 %173 }
  0xa0   : > { %vm175_vm1 = vcmp.eq.s32.totalorder %v159_v10, %v174_v11 }
  0xa1   : > { %v176_v13 = vsel %vm175_vm1, 0.903125, %v407_v12 }
  0xa2   : > { %v177_v14 = vmul.f32 %v176_v13, %v156_v1 }
  0xa4   : > { %v178_v15 = vsel %vm160_vm0, %v177_v14, 0.0 }
  0xa5   : > { %179 = vadd.xlane.f32.xlu1 %v178_v15 }
 0x10c   : > { %v169_v16 = vpop.xlane.xlu1 %168 }
 0x10d   : > { %340 = vlog2.f32 %v169_v16 }
 0x113   : > { %v341_v17 = vpop.eup %340 }
 0x114   : > { %v171_v18 = vmul.f32 0.6931472, %v341_v17 }
 0x116   : > { %v181_v19 = vadd.f32 %v171_v18, %v163_v4 }
 0x118   : > { %v180_v20 = vpop.xlane.xlu1 %179 }
 0x119   : > { %v182_v21 = vsub.f32 %v181_v19, %v180_v20 }
 0x11b   : > { %v184_v22 = vsel %vm183_vm2, %v182_v21, 0.0 }
 0x11c   : > { %185 = vadd.xlane.f32.xlu2 %v184_v22 }
 0x18f   : > { %v186_v23 = vpop.xlane.xlu2 %185 }
 0x190   : > { %v187_v24 = vrot.slane %v186_v23, 4 }
 0x192   : > { %v188_v25 = vadd.f32 %v187_v24, %v186_v23 }
 0x194   : > { %v189_v26 = vrot.slane %v188_v25, 2 }
 0x196   : > { %v190_v27 = vadd.f32 %v189_v26, %v188_v25 }
 0x198   : > { %v191_v28 = vrot.slane %v190_v27, 1 }
 0x19a   : > { %v192_v29 = vadd.f32 %v191_v28, %v190_v27 }
 0x19c   : > { %294 = vpush %v192_v29 }
 0x1cd   : > { %s295_s16 = spop %294 }
 0x1ce   : > { %v194_v30 = vstv %s295_s16 }
 0x1cf   : > { %195 = vst [vmem:[%s147_s7] sm:$0xff] %v194_v30 }
 0x1d0   : > { %369 = shalt.err (!%p366_p3)
}
 0x1d1   : > { %296 = dma.vmem_to_hbm [thread:$0]  (%p461_p5), %s210_s8, 128, %s212_s14, %s197_s17  }
 0x1d2 PF: > { %p302_p4 = scmp.ge.s32.totalorder %s404_s12, 2  ;;  %s223_s27 = sand.u32 1, %s392_s9  }
 0x1d3   : > { %s224_s28 = scalar_lea.sflag [#allocation3], %s223_s27 }
 0x1d4   : > { %p299_p7 = pnand %p302_p4, %p465_p6 }
 0x1d6   : > { %p300_p8 = pneg %p299_p7 }
 0x1d8   : > { %387 = dma.done.wait (%p300_p8), %s224_s28, 128  }
 0x1d9   : > { %389 = vsyncadd (%p300_p8), %s224_s28, 4294967168  ;;  %p12_p9 = scmp.ge.s32.totalorder %s448_s15, 4   ;;  %s519_s9 = smov %s396_s10 }
 0x1da   : > { %s520_s10 = smov %s400_s11  ;;  %s521_s11 = smov %s459_s18 }
 0x1db   : > { %s522_s12 = smov %s448_s15  ;;  %14 = sbr.rel (!%p12_p9) target bundleno = 3 (0x3), region = 66 }
 0x1e0   :  { %230 = vsyncpa [#allocation3], 1 }
 0x1e1   :  { %232 = vsyncpa [#allocation3 + $0x1], 1 }

</bundles_post_ra>
